<compile_context>
chip_gen: v5e
topology: v5e:2x2
jax: 0.10.0
libtpu: 0.0.40
codegen_flags: <defaults>
</compile_context>

<pallas_src>
import math

import jax
import jax.numpy as jnp
from jax.experimental import pallas as pl
from jax.experimental.pallas import tpu as pltpu


def rin_kernel(x_ref, mean_ref, std_ref, gain_ref, o_ref):
    """y = asinh((x - mean) / std) * gain, elementwise with per-channel mean/std."""
    x = x_ref[...]                                   # (tm, Dp) f32
    inv_std = 1.0 / std_ref[...]                     # (1, Dp)
    z = (x - mean_ref[...]) * inv_std                # broadcast along sublanes

    # asinh(z) = sign(z) * log(|z| + sqrt(z^2 + 1))  (log/sqrt/abs/where only)
    az = jnp.abs(z)
    a = jnp.log(az + jnp.sqrt(az * az + 1.0))
    z = jnp.where(z < 0, -a, a)

    gain = gain_ref[0]                               # scalar from SMEM
    o_ref[...] = (z * gain).astype(o_ref.dtype)


def _pick_row_tile(m_rows, d_lanes, max_rows=512, vmem_tile_bytes=2 << 20):
    """Largest row tile that divides m_rows, is a multiple of 8 (or the full
    extent) and keeps a single f32 tile within the VMEM budget."""
    cap = max(8, min(max_rows, vmem_tile_bytes // max(1, d_lanes * 4)))
    if m_rows <= cap:
        return m_rows
    t = (cap // 8) * 8
    while t >= 8:
        if m_rows % t == 0:
            return t
        t -= 8
    return m_rows  # fallback: whole extent (always layout-legal)


def running_instance_norm(x, running_mean, running_std, gain, *, max_row_tile=512):
    """x: (B, N, D) f32 -> (B, N, D). Eval-mode RunningInstanceNorm forward."""
    B, N, D = x.shape
    M = B * N

    x2 = x.reshape(M, D)
    mean2 = running_mean.reshape(1, D).astype(jnp.float32)
    std2 = running_std.reshape(1, D).astype(jnp.float32)
    gain1 = jnp.asarray(gain, dtype=jnp.float32).reshape(1)

    # Lane packing: make the last dim a multiple of 128 when possible so the
    # output store is lane-dense (unmasked vst). Per-channel params repeat
    # with period D along the packed row, so the math is unchanged.
    k = 1
    if D % 128 != 0:
        k_cand = math.lcm(D, 128) // D
        if M % k_cand == 0:
            k = k_cand
    Mp, Dp = M // k, D * k
    x2 = x2.reshape(Mp, Dp)
    if k > 1:
        mean2 = jnp.tile(mean2, (1, k))
        std2 = jnp.tile(std2, (1, k))

    tm = _pick_row_tile(Mp, Dp, max_rows=max_row_tile)
    grid = (Mp // tm,)

    out = pl.pallas_call(
        rin_kernel,
        out_shape=jax.ShapeDtypeStruct((Mp, Dp), x.dtype),
        grid_spec=pltpu.PrefetchScalarGridSpec(
            num_scalar_prefetch=0,
            grid=grid,
            in_specs=[
                pl.BlockSpec((tm, Dp), lambda i: (i, 0)),      # x tile
                pl.BlockSpec((1, Dp), lambda i: (0, 0)),       # running_mean (resident)
                pl.BlockSpec((1, Dp), lambda i: (0, 0)),       # running_std (resident)
                pl.BlockSpec(memory_space=pltpu.MemorySpace.SMEM),  # scalar gain
            ],
            out_specs=pl.BlockSpec((tm, Dp), lambda i: (i, 0)),
        ),
        compiler_params=pltpu.CompilerParams(
            dimension_semantics=("parallel",)),   # shards row tiles across TCs on v7x
    )(x2, mean2, std2, gain1)

    return out.reshape(M, D).reshape(B, N, D)


def running_instance_norm_ref(x, running_mean, running_std, gain):
    """Plain-JAX reference of the PyTorch eval forward."""
    z = (x - running_mean.reshape(1, 1, -1)) / running_std.reshape(1, 1, -1)
    z = jnp.arcsinh(z)
    return z * gain


if __name__ == "__main__":
    # Small shapes consistent with the module: batch=2, seq=8, dim=32.
    B, N, dim = 2, 8, 32

    key = jax.random.PRNGKey(0)
    k_x, k_m, k_s, k_g = jax.random.split(key, 4)

    x = jax.random.normal(k_x, (B, N, dim), dtype=jnp.float32)
    # Non-trivial running stats (buffers would normally come from training).
    running_mean = jax.random.normal(k_m, (dim,), dtype=jnp.float32) * 0.1
    running_std = jnp.abs(jax.random.normal(k_s, (dim,), dtype=jnp.float32)) * 0.5 + 0.75
    gain = jnp.float32(1.0) + jax.random.normal(k_g, (), dtype=jnp.float32) * 0.1

    y = running_instance_norm(x, running_mean, running_std, gain)
    jax.block_until_ready(y)

    y_ref = running_instance_norm_ref(x, running_mean, running_std, gain)
    assert y.shape == (B, N, dim)
    assert jnp.allclose(y, y_ref, atol=1e-5, rtol=1e-5), "mismatch vs reference"

    print("KERNEL_OK")
</pallas_src>

<mosaic_0001>
module attributes {stable_mosaic.version = 11 : i64} {
  func.func @rin_kernel(%arg0: i32, %arg1: memref<4x128xf32, #tpu.memory_space<vmem>>, %arg2: memref<1x128xf32, #tpu.memory_space<vmem>>, %arg3: memref<1x128xf32, #tpu.memory_space<vmem>>, %arg4: memref<1xf32, #tpu.memory_space<smem>>, %arg5: memref<4x128xf32, #tpu.memory_space<vmem>>) attributes {dimension_semantics = [#tpu.dimension_semantics<parallel>], iteration_bounds = array<i64: 1>, scalar_prefetch = 0 : i64, scratch_operands = 0 : i64, tpu.core_type = #tpu.core_type<tc>, window_params = [{transform_indices = @transform_0, window_bounds = array<i64: 4, 128>}, {pipeline_mode = #tpu.pipeline_mode<synchronous>, transform_indices = @transform_1, window_bounds = array<i64: 1, 128>}, {pipeline_mode = #tpu.pipeline_mode<synchronous>, transform_indices = @transform_2, window_bounds = array<i64: 1, 128>}, {transform_indices = @transform_3, window_bounds = array<i64: 1>}, {transform_indices = @transform_4, window_bounds = array<i64: 4, 128>}]} {
    %c0 = arith.constant 0 : index
    %c0_0 = arith.constant 0 : index
    %0 = vector.load %arg1[%c0, %c0_0] : memref<4x128xf32, #tpu.memory_space<vmem>>, vector<4x128xf32>
    %c0_1 = arith.constant 0 : index
    %c0_2 = arith.constant 0 : index
    %1 = vector.load %arg3[%c0_1, %c0_2] : memref<1x128xf32, #tpu.memory_space<vmem>>, vector<1x128xf32>
    %cst = arith.constant 1.000000e+00 : f32
    %2 = vector.broadcast %cst : f32 to vector<1x128xf32>
    %3 = arith.divf %2, %1 : vector<1x128xf32>
    %c0_3 = arith.constant 0 : index
    %c0_4 = arith.constant 0 : index
    %4 = vector.load %arg2[%c0_3, %c0_4] : memref<1x128xf32, #tpu.memory_space<vmem>>, vector<1x128xf32>
    %5 = vector.broadcast %4 : vector<1x128xf32> to vector<4x128xf32>
    %6 = arith.subf %0, %5 : vector<4x128xf32>
    %7 = vector.broadcast %3 : vector<1x128xf32> to vector<4x128xf32>
    %8 = arith.mulf %6, %7 : vector<4x128xf32>
    %9 = math.absf %8 : vector<4x128xf32>
    %10 = arith.mulf %9, %9 : vector<4x128xf32>
    %cst_5 = arith.constant 1.000000e+00 : f32
    %11 = vector.broadcast %cst_5 : f32 to vector<4x128xf32>
    %12 = arith.addf %10, %11 : vector<4x128xf32>
    %13 = math.sqrt %12 : vector<4x128xf32>
    %14 = arith.addf %9, %13 : vector<4x128xf32>
    %15 = math.log %14 : vector<4x128xf32>
    %cst_6 = arith.constant 0.000000e+00 : f32
    %16 = vector.broadcast %cst_6 : f32 to vector<4x128xf32>
    %17 = arith.cmpf olt, %8, %16 : vector<4x128xf32>
    %cst_7 = arith.constant 0.000000e+00 : f32
    %18 = vector.broadcast %cst_7 : f32 to vector<4x128xf32>
    %19 = arith.subf %18, %15 : vector<4x128xf32>
    %20 = arith.select %17, %19, %15 : vector<4x128xi1>, vector<4x128xf32>
    %c0_8 = arith.constant 0 : index
    %21 = memref.load %arg4[%c0_8] : memref<1xf32, #tpu.memory_space<smem>>
    %22 = vector.broadcast %21 : f32 to vector<4x128xf32>
    %23 = arith.mulf %20, %22 : vector<4x128xf32>
    %c0_9 = arith.constant 0 : index
    %c0_10 = arith.constant 0 : index
    %24 = vector.load %arg5[%c0_9, %c0_10] : memref<4x128xf32, #tpu.memory_space<vmem>>, vector<4x128xf32>
    tpu.vector_store %arg5[%c0_9, %c0_10], %23 {strides = array<i32>} : memref<4x128xf32, #tpu.memory_space<vmem>>, vector<4x128xf32>,
    return
  }
  func.func @transform_0(%arg0: i32) -> (i32, i32) {
    %c0_i32 = arith.constant 0 : i32
    %c0_i32_0 = arith.constant 0 : i32
    return %arg0, %c0_i32 : i32, i32
  }
  func.func @transform_1(%arg0: i32) -> (i32, i32) {
    %c0_i32 = arith.constant 0 : i32
    %c0_i32_0 = arith.constant 0 : i32
    %c0_i32_1 = arith.constant 0 : i32
    return %c0_i32, %c0_i32_0 : i32, i32
  }
  func.func @transform_2(%arg0: i32) -> (i32, i32) {
    %c0_i32 = arith.constant 0 : i32
    %c0_i32_0 = arith.constant 0 : i32
    %c0_i32_1 = arith.constant 0 : i32
    return %c0_i32, %c0_i32_0 : i32, i32
  }
  func.func @transform_3(%arg0: i32) -> i32 {
    %c0_i32 = arith.constant 0 : i32
    %c0_i32_0 = arith.constant 0 : i32
    return %c0_i32 : i32
  }
  func.func @transform_4(%arg0: i32) -> (i32, i32) {
    %c0_i32 = arith.constant 0 : i32
    %c0_i32_0 = arith.constant 0 : i32
    return %arg0, %c0_i32 : i32, i32
  }
}

</mosaic_0001>

<bundles_post_ra>
// kernel: tpu_custom_call.1
= control target key start
LH: loop header
LB: loop body
LE: loop exit
PB: predicated region body
PF: predicated region fallthrough
CT: control target
= control target key end

     0   :  { %10 = vsyncpa [#allocation4], 0  ;;  %s204_s0 = inlined_call_operand.hbm [shape: f32[4,128], index: 0, kind: input, shape index: {}]   ;;  %s205_s1 = inlined_call_operand.vmem [shape: f32[1,128], index: 1, kind: input, shape index: {}]   ;;  %s206_s2 = inlined_call_operand.vmem [shape: f32[1,128], index: 2, kind: input, shape index: {}]   ;;  %s207_s3 = inlined_call_operand.<no memory space> [shape: f32[1], index: 3, kind: input, shape index: {}]   ;;  %s208_s4 = inlined_call_operand.hbm [shape: f32[4,128], index: 4, kind: output, shape index: {}]  }
   0x1   :  { %11 = vsyncpa [#allocation5], 0  ;;  %s17_s17 = sshll.u32 %s204_s0, 4  ;;  %s162_s18 = smov [#allocation3]   ;;  %s18_s17 = int_to_ptr.hbm [resolvable:$true] %s17_s17 }
   0x2   :  { %s19_s19 = sshll.u32 %s162_s18, 4  ;;  %s20_s19 = int_to_ptr.vmem [resolvable:$true] %s19_s19 }
   0x3   :  { %22 = dma.hbm_to_vmem [thread:$0]  %s18_s17, 64, %s20_s19, [#allocation4]  }
   0x4   :  { %158 = dma.done.wait [#allocation4], 64  }
   0x5   :  { %159 = vsyncadd [#allocation4], 4294967232  ;;  %v34_v0 = vld [vmem:[%s206_s2] sm:$0x1]  ;;  %v81_v33 = vstv %s207_s3  ;;  %s163_s23 = smov [#allocation6]   ;;  %s91_s27 = sshll.u32 %s208_s4, 4  ;;  %s92_s27 = int_to_ptr.hbm [resolvable:$true] %s91_s27 }
   0x6   :  { %104 = vrcp.f32 %v34_v0  ;;  %v46_v3 = vand.u32 2147483648, %v34_v0  ;;  %vm40_vm0 = vweird.f32 %v34_v0  ;;  %v44_v5 = vand.u32 2147483647, %v34_v0  ;;  %v103_v7 = vld [vmem:[%s205_s1] ss:$0 sm:$0xff]  ;;  %s89_s24 = sshll.u32 %s163_s23, 4  ;;  %s90_s24 = int_to_ptr.vmem [resolvable:$true] %s89_s24 }
   0x7   :  { %v33_v8 = vld [vmem:[#allocation3] sm:$0xf] }
   0x8   :  { %v47_v9 = vor.u32 1.1754944e-38, %v46_v3  ;;  %vm45_vm3 = vcmp.eq.f32.partialorder %v44_v5, 8.507059e+37  ;;  %v54_v12 = vsub.f32 %v33_v8, %v103_v7 }
   0xc   :  { %v105_v1 = vpop.eup %104 }
   0xd   :  { %v36_v2 = vmul.f32 %v105_v1, %v34_v0  ;;  %vm41_vm1 = vweird.f32 %v105_v1 }
   0xe   :  { %vm42_vm2 = vmor %vm40_vm0, %vm41_vm1 }
   0xf   :  { %v37_v4 = vsub.f32 1.0, %v36_v2 }
  0x11   :  { %v38_v6 = vmul.f32 %v105_v1, %v37_v4 }
  0x13   :  { %v39_v10 = vadd.f32 %v105_v1, %v38_v6 }
  0x15   :  { %v43_v11 = vsel %vm42_vm2, %v105_v1, %v39_v10 }
  0x16   :  { %v48_v13 = vsel %vm45_vm3, %v47_v9, %v43_v11 }
  0x17   :  { %v56_v14 = vperm.slane %v48_v13, 0 }
  0x19   :  { %v58_v15 = vmul.f32 %v56_v14, %v54_v12 }
  0x1b   :  { %v59_v16 = vand.u32 2147483647, %v58_v15  ;;  %vm77_vm6 = vcmp.lt.f32.partialorder %v58_v15, 0.0 }
  0x1d   :  { %v60_v17 = vmul.f32 %v59_v16, %v59_v16 }
  0x1f   :  { %v61_v18 = vadd.f32 1.0, %v60_v17 }
  0x21   :  { %106 = vrsqrt.f32 %v61_v18  ;;  %vm69_vm4 = vcmp.eq.f32.partialorder %v61_v18, inf  ;;  %v72_v25 = vand.u32 2147483648, %v61_v18  ;;  %vm71_vm5 = vcmp.eq.f32.partialorder %v61_v18, 0.0 }
  0x27   :  { %v107_v19 = vpop.eup %106 }
  0x28   :  { %v63_v20 = vmul.f32 %v107_v19, %v61_v18 }
  0x2a   :  { %v64_v21 = vmul.f32 %v107_v19, %v63_v20 }
  0x2c   :  { %v65_v22 = vmul.f32 0.5, %v64_v21 }
  0x2e   :  { %v66_v23 = vsub.f32 1.5, %v65_v22 }
  0x30   :  { %v67_v24 = vmul.f32 %v107_v19, %v66_v23 }
  0x32   :  { %v68_v26 = vmul.f32 %v67_v24, %v61_v18 }
  0x34   :  { %v70_v27 = vsel %vm69_vm4, %v61_v18, %v68_v26 }
  0x35   :  { %v73_v28 = vsel %vm71_vm5, %v72_v25, %v70_v27 }
  0x36   :  { %v74_v29 = vadd.f32 %v73_v28, %v59_v16 }
  0x38   :  { %108 = vlog2.f32 %v74_v29 }
  0x3e   :  { %v109_v30 = vpop.eup %108 }
  0x3f   :  { %v76_v31 = vmul.f32 0.6931472, %v109_v30 }
  0x41   :  { %v78_v32 = vsub.f32 0.0, %v76_v31 }
  0x43   :  { %v79_v34 = vsel %vm77_vm6, %v78_v32, %v76_v31 }
  0x44   :  { %v82_v35 = vmul.f32 %v81_v33, %v79_v34 }
  0x46   :  { %83 = vst [vmem:[#allocation6] sm:$0xf] %v82_v35 }
  0x47   :  { %94 = dma.vmem_to_hbm [thread:$0]  %s90_s24, 64, %s92_s27, [#allocation5]  }
  0x48   :  { %160 = dma.done.wait [#allocation5], 64  }
  0x49   :  { %161 = vsyncadd [#allocation5], 4294967232 }
  0x4a   :  { %99 = vsyncpa [#allocation4], 1 }
  0x4b   :  { %100 = vsyncpa [#allocation5], 1 }

</bundles_post_ra>
